<compile_context>
chip_gen: v7x
topology: tpu7x:2x2x1
jax: 0.10.0
libtpu: 0.0.40
codegen_flags: <defaults>
</compile_context>

<pallas_src>
import numpy as np
import jax
import jax.numpy as jnp
from jax.experimental import pallas as pl
from jax.experimental.pallas import tpu as pltpu

H = W = 5
P = H * W                        # 25 spatial positions
C0, C1, C2, C3 = 30, 15, 7, 5    # depth, depth//2, depth//4, 5
NCLS = 10
D0, D1, D2, D3 = C0 * P, C1 * P, C2 * P, C3 * P   # 750, 375, 175, 125


def _round_up(v, m):
    return ((v + m - 1) // m) * m


# ------------------------------ Pallas kernel -------------------------------

def tree_classif_kernel(x_ref, t1_ref, b1_ref, t2_ref, b2_ref,
                        t3_ref, b3_ref, wl_ref, bl_ref, y_ref):
    wdt = t1_ref.dtype
    h = x_ref[...].astype(wdt)                                        # (BB, 750)

    z = jnp.dot(h, t1_ref[...], preferred_element_type=jnp.float32) + b1_ref[...]
    h = jnp.maximum(z, 0.0).astype(wdt)                               # (BB, 375)

    z = jnp.dot(h, t2_ref[...], preferred_element_type=jnp.float32) + b2_ref[...]
    h = jnp.maximum(z, 0.0).astype(wdt)                               # (BB, 175)

    z = jnp.dot(h, t3_ref[...], preferred_element_type=jnp.float32) + b3_ref[...]
    h = jnp.maximum(z, 0.0).astype(wdt)                               # (BB, 125)

    y = jnp.dot(h, wl_ref[...], preferred_element_type=jnp.float32) + bl_ref[...]
    y_ref[...] = y.astype(y_ref.dtype)                                # (BB, 10)


def _const_spec(shape):
    zeros = (0,) * len(shape)
    return pl.BlockSpec(shape, lambda i, _z=zeros: _z)


def _tpu_budget():
    """(BB cap, vmem_limit_bytes) sized per generation (v7x has only 64 MiB VMEM)."""
    try:
        vmem_cap = pltpu.get_tpu_info().vmem_capacity_bytes
    except Exception:
        vmem_cap = 64 * 1024 * 1024
    if vmem_cap >= 100 * 1024 * 1024:        # v5e / v6e: 128 MiB VMEM
        return 2048, 64 * 1024 * 1024
    return 1024, 48 * 1024 * 1024            # v7x: 64 MiB VMEM, keep headroom


def _pick_bb(B, block_cap):
    """Batch block: multiple of 8, >= 2 grid steps whenever B > 8 (v7x megacore),
    capped by the generation-aware block size."""
    cap = max(8, _round_up(int(block_cap), 8))
    bb = _round_up(pl.cdiv(max(int(B), 1), 2), 8)
    return max(8, min(bb, cap))


def tree_classif_convnet(x, kparams, block_b=None):
    """x: (B, 30, 5, 5) NCHW float32.  Returns (B, 10) float32 logits."""
    t1, b1, t2, b2, t3, b3, wl, bl = kparams
    B = x.shape[0]

    block_cap, vmem_limit = _tpu_budget()
    if block_b is not None:
        block_cap = int(block_b)

    # Flattened input in torch NCHW flatten order (c*25 + h*5 + w).  No host-side
    # dtype cast: the kernel casts in-register, keeping HBM traffic at one read.
    xf = x.reshape(B, D0)

    BB = _pick_bb(B, block_cap)
    Bp = _round_up(B, BB)
    if Bp != B:
        xf = jnp.pad(xf, ((0, Bp - B), (0, 0)))
    nblk = pl.cdiv(Bp, BB)

    out = pl.pallas_call(
        tree_classif_kernel,
        out_shape=jax.ShapeDtypeStruct((Bp, NCLS), jnp.float32),
        grid_spec=pltpu.PrefetchScalarGridSpec(
            num_scalar_prefetch=0,
            grid=(nblk,),
            in_specs=[
                pl.BlockSpec((BB, D0), lambda i: (i, 0)),
                _const_spec(t1.shape), _const_spec(b1.shape),
                _const_spec(t2.shape), _const_spec(b2.shape),
                _const_spec(t3.shape), _const_spec(b3.shape),
                _const_spec(wl.shape), _const_spec(bl.shape),
            ],
            out_specs=pl.BlockSpec((BB, NCLS), lambda i: (i, 0)),
        ),
        compiler_params=pltpu.CompilerParams(
            dimension_semantics=("parallel",),   # shard batch steps over v7x TCs
            vmem_limit_bytes=vmem_limit,
        ),
    )(xf, t1, b1, t2, b2, t3, b3, wl, bl)

    return out[:B]


# ------------- host-side lowering of conv weights to dense operators --------

def conv_to_dense(w):
    """(Cout, Cin, 3, 3) -> (Cin*25, Cout*25) dense SAME-conv operator.

    y_flat[co*25 + ho*5 + wo] = sum_row x_flat[row] * T[row, col]
    reproduces torch Conv2d(padding=1) on a 5x5 grid in NCHW flatten order."""
    w = np.asarray(w, np.float32)
    cout, cin = w.shape[0], w.shape[1]
    T = np.zeros((cin, H, W, cout, H, W), np.float32)
    for ky in range(3):
        for kx in range(3):
            dh, dw = ky - 1, kx - 1
            for ho in range(max(0, -dh), min(H, H - dh)):
                for wo in range(max(0, -dw), min(W, W - dw)):
                    hi, wi = ho + dh, wo + dw
                    T[:, hi, wi, :, ho, wo] = w[:, :, ky, kx].T     # (cin, cout)
    return jnp.asarray(T.reshape(cin * H * W, cout * H * W))


def to_kernel_params(tp, dtype=jnp.bfloat16):
    """bf16 weights by default (MXU-native); bias rows stay f32 (added to the f32
    accumulator inside the kernel)."""
    w1, b1, w2, b2, w3, b3, wl, bl = tp

    def bias_row(b):
        # bias per output position: index co*25 + p -> b[co]
        return jnp.asarray(np.repeat(np.asarray(b, np.float32), P)[None, :])

    return (conv_to_dense(w1).astype(dtype), bias_row(b1),
            conv_to_dense(w2).astype(dtype), bias_row(b2),
            conv_to_dense(w3).astype(dtype), bias_row(b3),
            jnp.asarray(np.asarray(wl, np.float32).T).astype(dtype),   # (125, 10)
            jnp.asarray(np.asarray(bl, np.float32)[None, :]))          # (1, 10) f32


# ---------------- deterministic parameter init (PyTorch-style shapes) -------

def init_torch_params(key):
    keys = jax.random.split(key, 8)

    def conv_init(kw, kb, cout, cin):
        bound = 1.0 / np.sqrt(cin * 9)
        w = jax.random.uniform(kw, (cout, cin, 3, 3), jnp.float32, -bound, bound)
        b = jax.random.uniform(kb, (cout,), jnp.float32, -bound, bound)
        return w, b

    w1, b1 = conv_init(keys[0], keys[1], C1, C0)
    w2, b2 = conv_init(keys[2], keys[3], C2, C1)
    w3, b3 = conv_init(keys[4], keys[5], C3, C2)
    bound = 1.0 / np.sqrt(H * W * C3)
    wl = jax.random.uniform(keys[6], (NCLS, H * W * C3), jnp.float32, -bound, bound)
    bl = jax.random.uniform(keys[7], (NCLS,), jnp.float32, -bound, bound)
    return (w1, b1, w2, b2, w3, b3, wl, bl)


def reference_forward(x, tp):
    w1, b1, w2, b2, w3, b3, wl, bl = tp
    dn = ('NCHW', 'OIHW', 'NCHW')

    def conv(h, w, b):
        y = jax.lax.conv_general_dilated(
            h, w, (1, 1), ((1, 1), (1, 1)), dimension_numbers=dn,
            precision=jax.lax.Precision.HIGHEST)
        return jax.nn.relu(y + b[None, :, None, None])

    h = conv(x, w1, b1)
    h = conv(h, w2, b2)
    h = conv(h, w3, b3)
    hf = h.reshape(x.shape[0], -1)   # torch Flatten of NCHW: (B, C*H*W)
    return hf @ wl.T + bl


if __name__ == "__main__":
    key = jax.random.PRNGKey(0)
    kx, kp = jax.random.split(key)
    x = jax.random.normal(kx, (2, C0, H, W), jnp.float32)   # NCHW input, batch=2
    tp = init_torch_params(kp)
    kparams = to_kernel_params(tp)                          # bf16 weights (default)

    y = tree_classif_convnet(x, kparams)
    y = jax.block_until_ready(y)

    y_ref = reference_forward(x, tp)
    assert y.shape == (2, NCLS)
    err = float(np.max(np.abs(np.asarray(y) - np.asarray(y_ref))))
    assert np.allclose(np.asarray(y), np.asarray(y_ref), rtol=2e-2, atol=2e-2), \
        f"kernel/reference mismatch, max abs err = {err}"
    print("KERNEL_OK")
</pallas_src>

<mosaic_0001>
module attributes {stable_mosaic.version = 11 : i64} {
  func.func @tree_classif_kernel(%arg0: i32, %arg1: memref<8x750xf32, #tpu.memory_space<vmem>>, %arg2: memref<750x375xbf16, #tpu.memory_space<vmem>>, %arg3: memref<1x375xf32, #tpu.memory_space<vmem>>, %arg4: memref<375x175xbf16, #tpu.memory_space<vmem>>, %arg5: memref<1x175xf32, #tpu.memory_space<vmem>>, %arg6: memref<175x125xbf16, #tpu.memory_space<vmem>>, %arg7: memref<1x125xf32, #tpu.memory_space<vmem>>, %arg8: memref<125x10xbf16, #tpu.memory_space<vmem>>, %arg9: memref<1x10xf32, #tpu.memory_space<vmem>>, %arg10: memref<8x10xf32, #tpu.memory_space<vmem>>) attributes {dimension_semantics = [#tpu.dimension_semantics<parallel>], iteration_bounds = array<i64: 1>, scalar_prefetch = 0 : i64, scratch_operands = 0 : i64, tpu.core_type = #tpu.core_type<tc>, window_params = [{transform_indices = @transform_0, window_bounds = array<i64: 8, 750>}, {pipeline_mode = #tpu.pipeline_mode<synchronous>, transform_indices = @transform_1, window_bounds = array<i64: 750, 375>}, {pipeline_mode = #tpu.pipeline_mode<synchronous>, transform_indices = @transform_2, window_bounds = array<i64: 1, 375>}, {pipeline_mode = #tpu.pipeline_mode<synchronous>, transform_indices = @transform_3, window_bounds = array<i64: 375, 175>}, {pipeline_mode = #tpu.pipeline_mode<synchronous>, transform_indices = @transform_4, window_bounds = array<i64: 1, 175>}, {pipeline_mode = #tpu.pipeline_mode<synchronous>, transform_indices = @transform_5, window_bounds = array<i64: 175, 125>}, {pipeline_mode = #tpu.pipeline_mode<synchronous>, transform_indices = @transform_6, window_bounds = array<i64: 1, 125>}, {pipeline_mode = #tpu.pipeline_mode<synchronous>, transform_indices = @transform_7, window_bounds = array<i64: 125, 10>}, {pipeline_mode = #tpu.pipeline_mode<synchronous>, transform_indices = @transform_8, window_bounds = array<i64: 1, 10>}, {transform_indices = @transform_9, window_bounds = array<i64: 8, 10>}]} {
    %c0 = arith.constant 0 : index
    %c0_0 = arith.constant 0 : index
    %0 = vector.load %arg1[%c0, %c0_0] : memref<8x750xf32, #tpu.memory_space<vmem>>, vector<8x750xf32>
    %1 = arith.truncf %0 : vector<8x750xf32> to vector<8x750xbf16>
    %c0_1 = arith.constant 0 : index
    %c0_2 = arith.constant 0 : index
    %2 = vector.load %arg2[%c0_1, %c0_2] : memref<750x375xbf16, #tpu.memory_space<vmem>>, vector<750x375xbf16>
    %cst = arith.constant dense<0.000000e+00> : vector<8x375xf32>
    %3 = tpu.matmul %1, %2, %cst {dimension_numbers = #tpu.dot_dimension_numbers<[1], [0], [0], [1], [0, 0, 1, 1], [], []>} : vector<8x750xbf16>, vector<750x375xbf16>, vector<8x375xf32> -> vector<8x375xf32>
    %c0_3 = arith.constant 0 : index
    %c0_4 = arith.constant 0 : index
    %4 = vector.load %arg3[%c0_3, %c0_4] : memref<1x375xf32, #tpu.memory_space<vmem>>, vector<1x375xf32>
    %5 = vector.broadcast %4 : vector<1x375xf32> to vector<8x375xf32>
    %6 = arith.addf %3, %5 : vector<8x375xf32>
    %cst_5 = arith.constant 0.000000e+00 : f32
    %7 = vector.broadcast %cst_5 : f32 to vector<8x375xf32>
    %8 = arith.maximumf %6, %7 : vector<8x375xf32>
    %9 = arith.truncf %8 : vector<8x375xf32> to vector<8x375xbf16>
    %c0_6 = arith.constant 0 : index
    %c0_7 = arith.constant 0 : index
    %10 = vector.load %arg4[%c0_6, %c0_7] : memref<375x175xbf16, #tpu.memory_space<vmem>>, vector<375x175xbf16>
    %cst_8 = arith.constant dense<0.000000e+00> : vector<8x175xf32>
    %11 = tpu.matmul %9, %10, %cst_8 {dimension_numbers = #tpu.dot_dimension_numbers<[1], [0], [0], [1], [0, 0, 1, 1], [], []>} : vector<8x375xbf16>, vector<375x175xbf16>, vector<8x175xf32> -> vector<8x175xf32>
    %c0_9 = arith.constant 0 : index
    %c0_10 = arith.constant 0 : index
    %12 = vector.load %arg5[%c0_9, %c0_10] : memref<1x175xf32, #tpu.memory_space<vmem>>, vector<1x175xf32>
    %13 = vector.broadcast %12 : vector<1x175xf32> to vector<8x175xf32>
    %14 = arith.addf %11, %13 : vector<8x175xf32>
    %cst_11 = arith.constant 0.000000e+00 : f32
    %15 = vector.broadcast %cst_11 : f32 to vector<8x175xf32>
    %16 = arith.maximumf %14, %15 : vector<8x175xf32>
    %17 = arith.truncf %16 : vector<8x175xf32> to vector<8x175xbf16>
    %c0_12 = arith.constant 0 : index
    %c0_13 = arith.constant 0 : index
    %18 = vector.load %arg6[%c0_12, %c0_13] : memref<175x125xbf16, #tpu.memory_space<vmem>>, vector<175x125xbf16>
    %cst_14 = arith.constant dense<0.000000e+00> : vector<8x125xf32>
    %19 = tpu.matmul %17, %18, %cst_14 {dimension_numbers = #tpu.dot_dimension_numbers<[1], [0], [0], [1], [0, 0, 1, 1], [], []>} : vector<8x175xbf16>, vector<175x125xbf16>, vector<8x125xf32> -> vector<8x125xf32>
    %c0_15 = arith.constant 0 : index
    %c0_16 = arith.constant 0 : index
    %20 = vector.load %arg7[%c0_15, %c0_16] : memref<1x125xf32, #tpu.memory_space<vmem>>, vector<1x125xf32>
    %21 = vector.broadcast %20 : vector<1x125xf32> to vector<8x125xf32>
    %22 = arith.addf %19, %21 : vector<8x125xf32>
    %cst_17 = arith.constant 0.000000e+00 : f32
    %23 = vector.broadcast %cst_17 : f32 to vector<8x125xf32>
    %24 = arith.maximumf %22, %23 : vector<8x125xf32>
    %25 = arith.truncf %24 : vector<8x125xf32> to vector<8x125xbf16>
    %c0_18 = arith.constant 0 : index
    %c0_19 = arith.constant 0 : index
    %26 = vector.load %arg8[%c0_18, %c0_19] : memref<125x10xbf16, #tpu.memory_space<vmem>>, vector<125x10xbf16>
    %cst_20 = arith.constant dense<0.000000e+00> : vector<8x10xf32>
    %27 = tpu.matmul %25, %26, %cst_20 {dimension_numbers = #tpu.dot_dimension_numbers<[1], [0], [0], [1], [0, 0, 1, 1], [], []>} : vector<8x125xbf16>, vector<125x10xbf16>, vector<8x10xf32> -> vector<8x10xf32>
    %c0_21 = arith.constant 0 : index
    %c0_22 = arith.constant 0 : index
    %28 = vector.load %arg9[%c0_21, %c0_22] : memref<1x10xf32, #tpu.memory_space<vmem>>, vector<1x10xf32>
    %29 = vector.broadcast %28 : vector<1x10xf32> to vector<8x10xf32>
    %30 = arith.addf %27, %29 : vector<8x10xf32>
    %c0_23 = arith.constant 0 : index
    %c0_24 = arith.constant 0 : index
    %31 = vector.load %arg10[%c0_23, %c0_24] : memref<8x10xf32, #tpu.memory_space<vmem>>, vector<8x10xf32>
    tpu.vector_store %arg10[%c0_23, %c0_24], %30 {strides = array<i32>} : memref<8x10xf32, #tpu.memory_space<vmem>>, vector<8x10xf32>,
    return
  }
  func.func @transform_0(%arg0: i32) -> (i32, i32) {
    %c0_i32 = arith.constant 0 : i32
    %c0_i32_0 = arith.constant 0 : i32
    return %arg0, %c0_i32 : i32, i32
  }
  func.func @transform_1(%arg0: i32) -> (i32, i32) {
    %c0_i32 = arith.constant 0 : i32
    %c0_i32_0 = arith.constant 0 : i32
    %c0_i32_1 = arith.constant 0 : i32
    return %c0_i32, %c0_i32_0 : i32, i32
  }
  func.func @transform_2(%arg0: i32) -> (i32, i32) {
    %c0_i32 = arith.constant 0 : i32
    %c0_i32_0 = arith.constant 0 : i32
    %c0_i32_1 = arith.constant 0 : i32
    return %c0_i32, %c0_i32_0 : i32, i32
  }
  func.func @transform_3(%arg0: i32) -> (i32, i32) {
    %c0_i32 = arith.constant 0 : i32
    %c0_i32_0 = arith.constant 0 : i32
    %c0_i32_1 = arith.constant 0 : i32
    return %c0_i32, %c0_i32_0 : i32, i32
  }
  func.func @transform_4(%arg0: i32) -> (i32, i32) {
    %c0_i32 = arith.constant 0 : i32
    %c0_i32_0 = arith.constant 0 : i32
    %c0_i32_1 = arith.constant 0 : i32
    return %c0_i32, %c0_i32_0 : i32, i32
  }
  func.func @transform_5(%arg0: i32) -> (i32, i32) {
    %c0_i32 = arith.constant 0 : i32
    %c0_i32_0 = arith.constant 0 : i32
    %c0_i32_1 = arith.constant 0 : i32
    return %c0_i32, %c0_i32_0 : i32, i32
  }
  func.func @transform_6(%arg0: i32) -> (i32, i32) {
    %c0_i32 = arith.constant 0 : i32
    %c0_i32_0 = arith.constant 0 : i32
    %c0_i32_1 = arith.constant 0 : i32
    return %c0_i32, %c0_i32_0 : i32, i32
  }
  func.func @transform_7(%arg0: i32) -> (i32, i32) {
    %c0_i32 = arith.constant 0 : i32
    %c0_i32_0 = arith.constant 0 : i32
    %c0_i32_1 = arith.constant 0 : i32
    return %c0_i32, %c0_i32_0 : i32, i32
  }
  func.func @transform_8(%arg0: i32) -> (i32, i32) {
    %c0_i32 = arith.constant 0 : i32
    %c0_i32_0 = arith.constant 0 : i32
    %c0_i32_1 = arith.constant 0 : i32
    return %c0_i32, %c0_i32_0 : i32, i32
  }
  func.func @transform_9(%arg0: i32) -> (i32, i32) {
    %c0_i32 = arith.constant 0 : i32
    %c0_i32_0 = arith.constant 0 : i32
    return %arg0, %c0_i32 : i32, i32
  }
}

</mosaic_0001>

<bundles_post_ra>
// kernel: tpu_custom_call.1
= control target key start
LH: loop header
LB: loop body
LE: loop exit
PB: predicated region body
PF: predicated region fallthrough
CT: control target
= control target key end

     0   :  { %14 = vsyncpa [#allocation3], 0  ;;  %s2972_s0 = inlined_call_operand.vmem [shape: f32[8,750], index: 0, kind: input, shape index: {}]   ;;  %s2973_s1 = inlined_call_operand.hbm [shape: bf16[750,375], index: 1, kind: input, shape index: {}]   ;;  %s2974_s2 = inlined_call_operand.vmem [shape: f32[1,375], index: 2, kind: input, shape index: {}]   ;;  %s2975_s3 = inlined_call_operand.vmem [shape: bf16[375,175], index: 3, kind: input, shape index: {}]   ;;  %s2976_s4 = inlined_call_operand.vmem [shape: f32[1,175], index: 4, kind: input, shape index: {}]   ;;  %s2977_s5 = inlined_call_operand.vmem [shape: bf16[175,125], index: 5, kind: input, shape index: {}]   ;;  %s2978_s6 = inlined_call_operand.vmem [shape: f32[1,125], index: 6, kind: input, shape index: {}]   ;;  %s2979_s7 = inlined_call_operand.vmem [shape: bf16[125,10], index: 7, kind: input, shape index: {}]   ;;  %s2980_s8 = inlined_call_operand.vmem [shape: f32[1,10], index: 8, kind: input, shape index: {}]   ;;  %s2981_s9 = inlined_call_operand.hbm [shape: f32[8,10], index: 9, kind: output, shape index: {}]  }
   0x1   :  { %15 = vsyncpa [#allocation4], 0  ;;  %s2593_s30 = smov [#allocation2]   ;;  %s2545_s13 = scalar_lea.hbm %s2973_s1, 18048 }
   0x2   :  { %s23_s10 = sshll.u32 %s2593_s30, 4  ;;  %p2546_p0 = scmp.ne.s32.totalorder %s2973_s1, %s2545_s13  ;;  %s24_s10 = int_to_ptr.vmem [resolvable:$true] %s23_s10 }
   0x3   :  { %p2549_p1 = scmp.lt.u32.totalorder %s2545_s13, %s2973_s1 }
   0x5   :  { %p2551_p2 = pnand %p2549_p1, %p2546_p0 }
   0x7   :  { %2554 = shalt.err (!%p2551_p2)
}
   0x8   :  { %s2555_s18 = scalar_lea.vmem %s24_s10, 18048  ;;  %p2560_p4 = scmp.lt.s32.totalorder %s24_s10, %s24_s10 }
   0x9   :  { %p2556_p3 = scmp.ne.s32.totalorder %s24_s10, %s2555_s18  ;;  %p2561_p5 = scmp.lt.s32.totalorder %s2555_s18, %s2555_s18 }
   0xb   :  { %p2562_p6 = por %p2561_p5, %p2560_p4 }
   0xd   :  { %p2563_p7 = pnand %p2562_p6, %p2556_p3 }
   0xf   :  { %2566 = shalt.err (!%p2563_p7)
}
  0x10   :  { %s2594_s19 = smov 192   ;;  %s2595_s20 = smov 12  }
  0x11   :  { %29 = dma.hbm_to_vmem [thread:$0]  %s2973_s1, 18048, %s24_s10, [#allocation3], %s2594_s19, %s2594_s19, %s2595_s20  }
  0x12   :  { %2589 = dma.done.wait [#allocation3], 18048  }
  0x13   :  { %2590 = vsyncadd [#allocation3], 4294949248  ;;  %v2267_v0 = vld [vmem:[#allocation2 + $0x4] ss:$12 sps:$4 sm:$0xff]   ;;  %v2269_v1 = vld [vmem:[#allocation2] ss:$12 sps:$4 sm:$0xff]  }
  0x14   :  { %1028 = vmatprep.subr.bf16.mxu0 %v2267_v0  ;;  %v2270_v2 = vld [vmem:[#allocation2 + $0x1c] ss:$12 sps:$4 sm:$0xff]   ;;  %v2272_v3 = vld [vmem:[#allocation2 + $0x18] ss:$12 sps:$4 sm:$0xff]   ;;  %v2273_v4 = vld [vmem:[#allocation2 + $0x34] ss:$12 sps:$4 sm:$0xff]  }
  0x15   :  { %1029 = vmatpush1.bf16.msra.mxu0 %v2269_v1  ;;  %v2278_v5 = vld [vmem:[#allocation2 + $0xc8] ss:$12 sps:$4 sm:$0xff]   ;;  %v2275_v6 = vld [vmem:[#allocation2 + $0x30] ss:$12 sps:$4 sm:$0xff]   ;;  %v2276_v8 = vld [vmem:[#allocation2 + $0x4c] ss:$12 sps:$4 sm:$0xff]  }
  0x16   :  { %1030 = vmatprep.subr.bf16.mxu0 %v2270_v2  ;;  %2170 = vmatprep.subr.bf16.mxu1 %v2278_v5  ;;  %v2280_v7 = vld [vmem:[#allocation2 + $0x8] ss:$12 sps:$4 sm:$0xff]   ;;  %v2283_v9 = vld [vmem:[#allocation2 + $0xe0] ss:$12 sps:$4 sm:$0xff]   ;;  %v2281_v12 = vld [vmem:[#allocation2 + $0x64] ss:$12 sps:$4 sm:$0xff]  }
  0x17   :  { %2171 = vmatpush3.bf16.msra.mxu1 %v2280_v7  ;;  %v2285_v10 = vld [vmem:[#allocation2 + $0x20] ss:$12 sps:$4 sm:$0xff]   ;;  %v2279_v11 = vld [vmem:[#allocation2 + $0x48] ss:$12 sps:$4 sm:$0xff]   ;;  %v2288_v13 = vld [vmem:[#allocation2 + $0xf8] ss:$12 sps:$4 sm:$0xff]  }
  0x18   :  { %2172 = vmatprep.subr.bf16.mxu1 %v2283_v9  ;;  %v2290_v14 = vld [vmem:[#allocation2 + $0x38] ss:$12 sps:$4 sm:$0xff]   ;;  %v2284_v15 = vld [vmem:[#allocation2 + $0x60] ss:$12 sps:$4 sm:$0xff]   ;;  %v2293_v16 = vld [vmem:[#allocation2 + $0x110] ss:$12 sps:$4 sm:$0xff]  }
  0x19   :  { %1031 = vmatpush1.bf16.msra.mxu0 %v2272_v3  ;;  %v2286_v17 = vld [vmem:[#allocation2 + $0x7c] ss:$12 sps:$4 sm:$0xff]   ;;  %v2289_v19 = vld [vmem:[#allocation2 + $0x78] ss:$12 sps:$4 sm:$0xff]   ;;  %v2291_v21 = vld [vmem:[#allocation2 + $0x94] ss:$12 sps:$4 sm:$0xff]  }
  0x1a   :  { %1032 = vmatprep.subr.bf16.mxu0 %v2273_v4  ;;  %v2295_v18 = vld [vmem:[#allocation2 + $0x50] ss:$12 sps:$4 sm:$0xff]   ;;  %v2298_v20 = vld [vmem:[#allocation2 + $0x128] ss:$12 sps:$4 sm:$0xff]   ;;  %v2303_v23 = vld [vmem:[#allocation2 + $0x140] ss:$12 sps:$4 sm:$0xff]  }
  0x1b   :  { %2173 = vmatpush3.bf16.msra.mxu1 %v2285_v10  ;;  %v2300_v22 = vld [vmem:[#allocation2 + $0x68] ss:$12 sps:$4 sm:$0xff]   ;;  %v2294_v24 = vld [vmem:[#allocation2 + $0x90] ss:$12 sps:$4 sm:$0xff]   ;;  %v2296_v25 = vld [vmem:[#allocation2 + $0xac] ss:$12 sps:$4 sm:$0xff]  }
  0x1c   :  { %2174 = vmatprep.subr.bf16.mxu1 %v2288_v13  ;;  %v2305_v26 = vld [vmem:[#allocation2 + $0x80] ss:$12 sps:$4 sm:$0xff]   ;;  %v2308_v27 = vld [vmem:[#allocation2 + $0x158] ss:$12 sps:$4 sm:$0xff]   ;;  %v2299_v28 = vld [vmem:[#allocation2 + $0xa8] ss:$12 sps:$4 sm:$0xff]  }
  0x1d   :  { %1033 = vmatpush1.bf16.msra.mxu0 %v2275_v6  ;;  %v2301_v29 = vld [vmem:[#allocation2 + $0xc4] ss:$12 sps:$4 sm:$0xff]   ;;  %v2304_v32 = vld [vmem:[#allocation2 + $0xc0] ss:$12 sps:$4 sm:$0xff]   ;;  %v2306_v34 = vld [vmem:[#allocation2 + $0xdc] ss:$12 sps:$4 sm:$0xff]  }
  0x1e   :  { %1034 = vmatprep.subr.bf16.mxu0 %v2276_v8  ;;  %v2310_v30 = vld [vmem:[#allocation2 + $0x98] ss:$12 sps:$4 sm:$0xff]   ;;  %v2313_v31 = vld [vmem:[#allocation2 + $0x170] ss:$12 sps:$4 sm:$0xff]   ;;  %v49_v33 = vld [vmem:[%s2972_s0 + $0x8] sm:$0xff]  ;;  %vm1014_vm0 = vcmask 900096  }
  0x1f   :  { %2175 = vmatpush3.bf16.msra.mxu1 %v2290_v14  ;;  %v55_v35 = vpack.c.bf16 %v49_v33, %v49_v33  ;;  %v2315_v36 = vld [vmem:[#allocation2 + $0xb0] ss:$12 sps:$4 sm:$0xff]   ;;  %v48_v37 = vld [vmem:[%s2972_s0] sm:$0xff]  ;;  %v2318_v38 = vld [vmem:[#allocation2 + $0x248] ss:$12 sps:$4 sm:$0xff]   ;;  %v2596_v14 = vmov 0  }
  0x20   :  { %2176 = vmatprep.subr.bf16.mxu1 %v2293_v16  ;;  %v2309_v39 = vld [vmem:[#allocation2 + $0xd8] ss:$12 sps:$4 sm:$0xff]   ;;  %v2311_v40 = vld [vmem:[#allocation2 + $0xf4] ss:$12 sps:$4 sm:$0xff]   ;;  %v2669_v41 = vpack.c.bf16 %v48_v37, %v48_v37  ;;  %v2314_v44 = vld [vmem:[#allocation2 + $0xf0] ss:$12 sps:$4 sm:$0xff]  }
  0x21   :  { %1035 = vmatpush1.bf16.msra.mxu0 %v2279_v11  ;;  %1183 = vmatprep.mubr.bf16.mxu1 %v55_v35  ;;  %v2320_v42 = vld [vmem:[#allocation2 + $0x188] ss:$12 sps:$4 sm:$0xff]   ;;  %v2323_v43 = vld [vmem:[#allocation2 + $0x260] ss:$12 sps:$4 sm:$0xff]   ;;  %v2328_v47 = vld [vmem:[#allocation2 + $0x278] ss:$12 sps:$4 sm:$0xff]  }
  0x22   :  { %1036 = vmatprep.subr.bf16.mxu0 %v2281_v12  ;;  %1060 = vmatprep.mubr.bf16.mxu0 %v55_v35  ;;  %v2316_v45 = vld [vmem:[#allocation2 + $0x10c] ss:$12 sps:$4 sm:$0xff]   ;;  %v2319_v48 = vld [vmem:[#allocation2 + $0x108] ss:$12 sps:$4 sm:$0xff]   ;;  %v2321_v49 = vld [vmem:[#allocation2 + $0x124] ss:$12 sps:$4 sm:$0xff]  }
  0x23   :  { %2177 = vmatpush3.bf16.msra.mxu1 %v2295_v18  ;;  %v2325_v46 = vld [vmem:[#allocation2 + $0x1a0] ss:$12 sps:$4 sm:$0xff]   ;;  %v2330_v50 = vld [vmem:[#allocation2 + $0x1b8] ss:$12 sps:$4 sm:$0xff]   ;;  %v2333_v51 = vld [vmem:[#allocation2 + $0x290] ss:$12 sps:$4 sm:$0xff]  }
  0x24   :  { %2178 = vmatprep.subr.bf16.mxu1 %v2298_v20  ;;  %v2324_v52 = vld [vmem:[#allocation2 + $0x120] ss:$12 sps:$4 sm:$0xff]   ;;  %v2326_v53 = vld [vmem:[#allocation2 + $0x13c] ss:$12 sps:$4 sm:$0xff]   ;;  %v2329_v56 = vld [vmem:[#allocation2 + $0x138] ss:$12 sps:$4 sm:$0xff]  }
  0x25   :  { %1037 = vmatpush1.bf16.msra.mxu0 %v2284_v15  ;;  %v2335_v54 = vld [vmem:[#allocation2 + $0x1d0] ss:$12 sps:$4 sm:$0xff]   ;;  %v2338_v55 = vld [vmem:[#allocation2 + $0x2a8] ss:$12 sps:$4 sm:$0xff]   ;;  %v2344_v59 = vld [vmem:[#allocation2 + $0x2c0] ss:$12 sps:$4 sm:$0xff]  }
  0x26   :  { %1038 = vmatprep.subr.bf16.mxu0 %v2286_v17  ;;  %v2331_v57 = vld [vmem:[#allocation2 + $0x154] ss:$12 sps:$4 sm:$0xff]   ;;  %v2334_v60 = vld [vmem:[#allocation2 + $0x150] ss:$12 sps:$4 sm:$0xff]   ;;  %v2336_v61 = vld [vmem:[#allocation2 + $0x16c] ss:$12 sps:$4 sm:$0xff]  }
  0x27   :  { %2179 = vmatpush3.bf16.msra.mxu1 %v2300_v22  ;;  %v2340_v58 = vld [vmem:[#allocation2 + $0x1e8] ss:$12 sps:$4 sm:$0xff]   ;;  %v2345_v62 = vld [vmem:[#allocation2 + $0x200] ss:$12 sps:$4 sm:$0xff]   ;;  %v2349_v63 = vld [vmem:[#allocation2 + $0x2d8] ss:$12 sps:$4 sm:$0xff]  }
  0x28   :  { %2180 = vmatprep.subr.bf16.mxu1 %v2303_v23  ;;  %v2339_v0 = vld [vmem:[#allocation2 + $0x168] ss:$12 sps:$4 sm:$0xff]   ;;  %v51_v1 = vld [vmem:[%s2972_s0 + $0x18] sm:$0xff]  ;;  %v2343_v2 = vld [vmem:[#allocation2 + $0x184] ss:$12 sps:$4 sm:$0xff]   ;;  %vm1018_vm1 = vcmask 1046528  }
  0x29   :  { %1039 = vmatpush1.bf16.msra.mxu0 %v2289_v19  ;;  %v57_v3 = vpack.c.bf16 %v51_v1, %v51_v1  ;;  %v2350_v4 = vld [vmem:[#allocation2 + $0x218] ss:$12 sps:$4 sm:$0xff]   ;;  %v2354_v5 = vld [vmem:[#allocation2 + $0x2f0] ss:$12 sps:$4 sm:$0xff]   ;;  %v2341_v6 = vld [vmem:[#allocation2 + $0x180] ss:$12 sps:$4 sm:$0xff]  }
  0x2a   :  { %1040 = vmatprep.subr.bf16.mxu0 %v2291_v21  ;;  %v2348_v7 = vld [vmem:[#allocation2 + $0x19c] ss:$12 sps:$4 sm:$0xff]   ;;  %v50_v9 = vld [vmem:[%s2972_s0 + $0x10] sm:$0xff]  ;;  %v2346_v10 = vld [vmem:[#allocation2 + $0x198] ss:$12 sps:$4 sm:$0xff]   ;;  %vm1575_vm2 = vcmask 1042432  }
  0x2b   :  { %2181 = vmatpush3.bf16.msra.mxu1 %v2305_v26  ;;  %v2355_v8 = vld [vmem:[#allocation2 + $0x230] ss:$12 sps:$4 sm:$0xff]   ;;  %v2353_v11 = vld [vmem:[#allocation2 + $0x1b4] ss:$12 sps:$4 sm:$0xff]   ;;  %v2679_v12 = vpack.c.bf16 %v50_v9, %v50_v9  ;;  %v2358_v16 = vld [vmem:[#allocation2 + $0x1cc] ss:$12 sps:$4 sm:$0xff]  }
  0x2c   :  { %2182 = vmatprep.subr.bf16.mxu1 %v2308_v27  ;;  %v2359_v13 = vld [vmem:[#allocation2 + $0x308] ss:$12 sps:$4 sm:$0xff]   ;;  %v2351_v15 = vld [vmem:[#allocation2 + $0x1b0] ss:$12 sps:$4 sm:$0xff]   ;;  %v2363_v17 = vld [vmem:[#allocation2 + $0x320] ss:$12 sps:$4 sm:$0xff]  }
  0x2d   :  { %1041 = vmatpush1.bf16.msra.mxu0 %v2294_v24  ;;  %v2356_v18 = vld [vmem:[#allocation2 + $0x1c8] ss:$12 sps:$4 sm:$0xff]   ;;  %v2362_v19 = vld [vmem:[#allocation2 + $0x1e4] ss:$12 sps:$4 sm:$0xff]   ;;  %v2360_v21 = vld [vmem:[#allocation2 + $0x1e0] ss:$12 sps:$4 sm:$0xff]  }
  0x2e   :  { %1042 = vmatprep.subr.bf16.mxu0 %v2296_v25  ;;  %v2367_v20 = vld [vmem:[#allocation2 + $0x338] ss:$12 sps:$4 sm:$0xff]   ;;  %v2366_v22 = vld [vmem:[#allocation2 + $0x1fc] ss:$12 sps:$4 sm:$0xff]   ;;  %v2370_v25 = vld [vmem:[#allocation2 + $0x214] ss:$12 sps:$4 sm:$0xff]  }
  0x2f   :  { %2183 = vmatpush3.bf16.msra.mxu1 %v2310_v30  ;;  %v2371_v23 = vld [vmem:[#allocation2 + $0x350] ss:$12 sps:$4 sm:$0xff]   ;;  %v2364_v24 = vld [vmem:[#allocation2 + $0x1f8] ss:$12 sps:$4 sm:$0xff]   ;;  %v2375_v26 = vld [vmem:[#allocation2 + $0x368] ss:$12 sps:$4 sm:$0xff]  }
  0x30   :  { %2184 = vmatprep.subr.bf16.mxu1 %v2313_v31  ;;  %v2368_v27 = vld [vmem:[#allocation2 + $0x210] ss:$12 sps:$4 sm:$0xff]   ;;  %v2372_v30 = vld [vmem:[#allocation2 + $0x228] ss:$12 sps:$4 sm:$0xff]   ;;  %v2376_v35 = vld [vmem:[#allocation2 + $0x240] ss:$12 sps:$4 sm:$0xff]  }
  0x31   :  { %1043 = vmatpush1.bf16.msra.mxu0 %v2299_v28  ;;  %v2374_v28 = vld [vmem:[#allocation2 + $0x22c] ss:$12 sps:$4 sm:$0xff]   ;;  %v2378_v31 = vld [vmem:[#allocation2 + $0x244] ss:$12 sps:$4 sm:$0xff]   ;;  %v2418_v1 = vld [vmem:[#allocation2 + $0x334] ss:$12 sps:$4 sm:$0xff]  }
  0x32   :  { %1044 = vmatprep.subr.bf16.mxu0 %v2301_v29  ;;  %v2379_v29 = vld [vmem:[#allocation2 + $0x380] ss:$12 sps:$4 sm:$0xff]   ;;  %v2387_v37 = vld [vmem:[#allocation2 + $0x3b0] ss:$12 sps:$4 sm:$0xff]   ;;  %vm1576_vm3 = vcmask 1043456   ;;  %vm1571_vm4 = vcmask 973824  }
  0x33   :  { %2185 = vmatpush3.bf16.msra.mxu1 %v2315_v36  ;;  %v53_v33 = vld [vmem:[%s2972_s0 + $0x28] sm:$0xff]  ;;  %v2430_v9 = vld [vmem:[#allocation2 + $0x394] ss:$12 sps:$4 sm:$0xff]   ;;  %vm1769_vm5 = vcmask 1047552   ;;  %vm1765_vm6 = vcmask 384000   ;;  %vm1891_vm7 = vcmask 1045504  }
  0x34   :  { %2192 = vmatprep.subr.bf16.mxu1 %v2318_v38  ;;  %v2382_v36 = vld [vmem:[#allocation2 + $0x25c] ss:$12 sps:$4 sm:$0xff]   ;;  %v2380_v38 = vld [vmem:[#allocation2 + $0x258] ss:$12 sps:$4 sm:$0xff]   ;;  %vm2599_vm8 = vmmov 0   ;;  %vm1887_vm9 = vcmask 1022976  }
  0x35   :  { %1045 = vmatpush1.bf16.msra.mxu0 %v2304_v32  ;;  %v2383_v32 = vld [vmem:[#allocation2 + $0x398] ss:$12 sps:$4 sm:$0xff]   ;;  %s2600_s29 = smov [#allocation5]   ;;  %vm1937_vm10 = vcmask 80896  }
  0x36   :  { %1046 = vmatprep.subr.bf16.mxu0 %v2306_v34  ;;  %1184 = vmatmul.mubr.bf16.vlgmr.msra.gmra.mrb[0].mxu1 %v2669_v41  ;;  %v2692_v34 = vpack.c.bf16 %v53_v33, %v53_v33  ;;  %v2463_v33 = vld [vmem:[%s2975_s3 + $0x24] ss:$8 sps:$4 sm:$0xff]   ;;  %s1945_s30 = sshll.u32 %s2600_s29, 4  ;;  %s1946_s30 = int_to_ptr.vmem [resolvable:$true] %s1945_s30 }
  0x37   :  { %2193 = vmatpush3.bf16.msra.mxu1 %v2320_v42  ;;  %1223 = vmatprep.mubr.bf16.mxu1 %v57_v3  ;;  %v2390_v42 = vld [vmem:[#allocation2 + $0x28c] ss:$12 sps:$4 sm:$0xff]   ;;  %p2572_p9 = scmp.lt.s32.totalorder %s1946_s30, %s1946_s30 }
  0x38   :  { %2194 = vmatprep.subr.bf16.mxu1 %v2323_v43  ;;  %v2395_v43 = vld [vmem:[#allocation2 + $0x3e0] ss:$12 sps:$4 sm:$0xff]  }
  0x39   :  { %1047 = vmatpush1.bf16.msra.mxu0 %v2309_v39  ;;  %v2386_v39 = vld [vmem:[#allocation2 + $0x274] ss:$12 sps:$4 sm:$0xff]  }
  0x3a   :  { %1048 = vmatprep.subr.bf16.mxu0 %v2311_v40  ;;  %v2391_v40 = vld [vmem:[#allocation2 + $0x3c8] ss:$12 sps:$4 sm:$0xff]  }
  0x3b   :  { %2195 = vmatpush3.bf16.msra.mxu1 %v2325_v46  ;;  %v2399_v46 = vld [vmem:[#allocation2 + $0x3f8] ss:$12 sps:$4 sm:$0xff]  }
  0x3c   :  { %2196 = vmatprep.subr.bf16.mxu1 %v2328_v47  ;;  %v2392_v47 = vld [vmem:[#allocation2 + $0x2a0] ss:$12 sps:$4 sm:$0xff]  }
  0x3d   :  { %1049 = vmatpush1.bf16.msra.mxu0 %v2314_v44  ;;  %v2388_v44 = vld [vmem:[#allocation2 + $0x288] ss:$12 sps:$4 sm:$0xff]  }
  0x3e   :  { %1050 = vmatprep.subr.bf16.mxu0 %v2316_v45  ;;  %v2394_v45 = vld [vmem:[#allocation2 + $0x2a4] ss:$12 sps:$4 sm:$0xff]  }
  0x3f   :  { %2197 = vmatpush3.bf16.msra.mxu1 %v2330_v50  ;;  %v2396_v50 = vld [vmem:[#allocation2 + $0x2b8] ss:$12 sps:$4 sm:$0xff]  }
  0x40   :  { %2198 = vmatprep.subr.bf16.mxu1 %v2333_v51  ;;  %v2402_v51 = vld [vmem:[#allocation2 + $0x2d4] ss:$12 sps:$4 sm:$0xff]  }
  0x41   :  { %1051 = vmatpush1.bf16.msra.mxu0 %v2319_v48  ;;  %v2398_v48 = vld [vmem:[#allocation2 + $0x2bc] ss:$12 sps:$4 sm:$0xff]  }
  0x42   :  { %1052 = vmatprep.subr.bf16.mxu0 %v2321_v49  ;;  %v2403_v49 = vld [vmem:[#allocation2 + $0x410] ss:$12 sps:$4 sm:$0xff]  }
  0x43   :  { %2199 = vmatpush3.bf16.msra.mxu1 %v2335_v54  ;;  %v2406_v54 = vld [vmem:[#allocation2 + $0x2ec] ss:$12 sps:$4 sm:$0xff]  }
  0x44   :  { %2200 = vmatprep.subr.bf16.mxu1 %v2338_v55  ;;  %v2411_v55 = vld [vmem:[#allocation2 + $0x440] ss:$12 sps:$4 sm:$0xff]  }
  0x45   :  { %1053 = vmatpush1.bf16.msra.mxu0 %v2324_v52  ;;  %v2407_v52 = vld [vmem:[#allocation2 + $0x428] ss:$12 sps:$4 sm:$0xff]  }
  0x46   :  { %1054 = vmatprep.subr.bf16.mxu0 %v2326_v53  ;;  %v2400_v53 = vld [vmem:[#allocation2 + $0x2d0] ss:$12 sps:$4 sm:$0xff]  }
  0x47   :  { %2201 = vmatpush3.bf16.msra.mxu1 %v2340_v58  ;;  %v2410_v58 = vld [vmem:[#allocation2 + $0x304] ss:$12 sps:$4 sm:$0xff]  }
  0x48   :  { %2202 = vmatprep.subr.bf16.mxu1 %v2344_v59  ;;  %v52_v59 = vld [vmem:[%s2972_s0 + $0x20] sm:$0xff] }
  0x49   :  { %1055 = vmatpush1.bf16.msra.mxu0 %v2329_v56  ;;  %v2415_v56 = vld [vmem:[#allocation2 + $0x458] ss:$12 sps:$4 sm:$0x7f]  }
  0x4a   :  { %1056 = vmatprep.subr.bf16.mxu0 %v2331_v57  ;;  %v2404_v57 = vld [vmem:[#allocation2 + $0x2e8] ss:$12 sps:$4 sm:$0xff]  }
  0x4b   :  { %2203 = vmatpush3.bf16.msra.mxu1 %v2345_v62  ;;  %v1026_v62 = vsel %vm1018_vm1, %v2415_v56, 0  ;;  %v2490_v56 = vld [vmem:[%s2975_s3 + $0xb4] ss:$8 sps:$4 sm:$0xff]  }
  0x4c   :  { %2204 = vmatprep.subr.bf16.mxu1 %v2349_v63  ;;  %v2708_v63 = vpack.c.bf16 %v52_v59, %v52_v59  ;;  %v2491_v59 = vld [vmem:[%s2975_s3 + $0xc0] ss:$8 sps:$4 sm:$0xff]  }
  0x4d   :  { %1057 = vmatpush1.bf16.msra.mxu0 %v2334_v60  ;;  %v2408_v60 = vld [vmem:[#allocation2 + $0x300] ss:$12 sps:$4 sm:$0xff]  }
  0x4e   :  { %1058 = vmatprep.subr.bf16.mxu0 %v2336_v61  ;;  %v2414_v61 = vld [vmem:[#allocation2 + $0x31c] ss:$12 sps:$4 sm:$0xff]  }
  0x4f   :  { %2205 = vmatpush3.bf16.msra.mxu1 %v2350_v4  ;;  %v2419_v4 = vld [vmem:[#allocation2 + $0x348] ss:$12 sps:$4 sm:$0xff]  }
  0x50   :  { %2206 = vmatprep.subr.bf16.mxu1 %v2354_v5  ;;  %v2424_v5 = vld [vmem:[#allocation2 + $0x364] ss:$12 sps:$4 sm:$0xff]  }
  0x51   :  { %1059 = vmatpush1.bf16.msra.mxu0 %v2339_v0  ;;  %v2412_v0 = vld [vmem:[#allocation2 + $0x318] ss:$12 sps:$4 sm:$0xff]  }
  0x52   :  { %1069 = vmatprep.subr.bf16.mxu0 %v2343_v2  ;;  %v2416_v2 = vld [vmem:[#allocation2 + $0x330] ss:$12 sps:$4 sm:$0xff]  }
  0x53   :  { %2207 = vmatpush3.bf16.msra.mxu1 %v2355_v8  ;;  %v2425_v8 = vld [vmem:[#allocation2 + $0x378] ss:$12 sps:$4 sm:$0xff]  }
  0x54   :  { %1061 = vmatmul.mubr.bf16.vlgmr.msra.gmra.mrb[0].mxu0 %v2669_v41  ;;  %1231 = vmatprep.subr.bf16.mxu1 %v2596_v14  ;;  %v2384_v41 = vld [vmem:[#allocation2 + $0x270] ss:$12 sps:$4 sm:$0xff]  }
  0x55   :  { %1070 = vmatpush1.bf16.msra.mxu0 %v2341_v6  ;;  %1101 = vmatprep.mubr.bf16.mxu0 %v57_v3  ;;  %v2421_v3 = vld [vmem:[#allocation2 + $0x34c] ss:$12 sps:$4 sm:$0xff]  }
  0x56   :  { %1071 = vmatprep.subr.bf16.mxu0 %v2348_v7  ;;  %1224 = vmatmul.mubr.bf16.vlgmr.msra.gmra.mrb[4].mxu1 %v2679_v12  ;;  %v2422_v6 = vld [vmem:[#allocation2 + $0x360] ss:$12 sps:$4 sm:$0xff]   ;;  %v2427_v7 = vld [vmem:[#allocation2 + $0x37c] ss:$12 sps:$4 sm:$0xff]  }
  0x57   :  { %1232 = vmatpush1.bf16.msra.mxu1 %v2359_v13  ;;  %2097 = vmatprep.mubr.msk.bf16.mxu1 %vm1014_vm0, %v2692_v34  ;;  %v2436_v13 = vld [vmem:[#allocation2 + $0x3c4] ss:$12 sps:$4 sm:$0xff]  }
  0x58   :  { %1233 = vmatprep.subr.bf16.mxu1 %v2596_v14 }
  0x59   :  { %1072 = vmatpush1.bf16.msra.mxu0 %v2346_v10  ;;  %v2428_v10 = vld [vmem:[#allocation2 + $0x390] ss:$12 sps:$4 sm:$0xff]  }
  0x5a   :  { %1073 = vmatprep.subr.bf16.mxu0 %v2353_v11  ;;  %v2433_v11 = vld [vmem:[#allocation2 + $0x3ac] ss:$12 sps:$4 sm:$0xff]  }
  0x5b   :  { %1234 = vmatpush1.bf16.msra.mxu1 %v2363_v17  ;;  %v2434_v17 = vld [vmem:[#allocation2 + $0x3c0] ss:$12 sps:$4 sm:$0xff]  }
  0x5c   :  { %1235 = vmatprep.subr.bf16.mxu1 %v2596_v14 }
  0x5d   :  { %1074 = vmatpush1.bf16.msra.mxu0 %v2351_v15  ;;  %v2455_v15 = vld [vmem:[%s2975_s3] ss:$8 sps:$4 sm:$0xff]  }
  0x5e   :  { %1075 = vmatprep.subr.bf16.mxu0 %v2358_v16  ;;  %v2457_v16 = vld [vmem:[%s2975_s3 + $0x4] ss:$8 sps:$4 sm:$0xff]  }
  0x5f   :  { %1236 = vmatpush1.bf16.msra.mxu1 %v2367_v20  ;;  %v2442_v20 = vld [vmem:[#allocation2 + $0x3f4] ss:$12 sps:$4 sm:$0xff]  }
  0x60   :  { %1237 = vmatprep.subr.bf16.mxu1 %v2596_v14 }
  0x61   :  { %1076 = vmatpush1.bf16.msra.mxu0 %v2356_v18  ;;  %v2439_v18 = vld [vmem:[#allocation2 + $0x3dc] ss:$12 sps:$4 sm:$0xff]  }
  0x62   :  { %1077 = vmatprep.subr.bf16.mxu0 %v2362_v19  ;;  %v2437_v19 = vld [vmem:[#allocation2 + $0x3d8] ss:$12 sps:$4 sm:$0xff]  }
  0x63   :  { %1238 = vmatpush1.bf16.msra.mxu1 %v2371_v23  ;;  %v2443_v23 = vld [vmem:[#allocation2 + $0x408] ss:$12 sps:$4 sm:$0xff]  }
  0x64   :  { %1239 = vmatprep.subr.bf16.mxu1 %v2596_v14 }
  0x65   :  { %1078 = vmatpush1.bf16.msra.mxu0 %v2360_v21  ;;  %v2440_v21 = vld [vmem:[#allocation2 + $0x3f0] ss:$12 sps:$4 sm:$0xff]  }
  0x66   :  { %1079 = vmatprep.subr.bf16.mxu0 %v2366_v22  ;;  %v2445_v22 = vld [vmem:[#allocation2 + $0x40c] ss:$12 sps:$4 sm:$0xff]  }
  0x67   :  { %1240 = vmatpush1.bf16.msra.mxu1 %v2375_v26  ;;  %v2451_v26 = vld [vmem:[#allocation2 + $0x43c] ss:$12 sps:$4 sm:$0xff]  }
  0x68   :  { %1241 = vmatprep.subr.bf16.mxu1 %v2596_v14 }
  0x69   :  { %1080 = vmatpush1.bf16.msra.mxu0 %v2364_v24  ;;  %v2448_v24 = vld [vmem:[#allocation2 + $0x424] ss:$12 sps:$4 sm:$0xff]  }
  0x6a   :  { %1081 = vmatprep.subr.bf16.mxu0 %v2370_v25  ;;  %v2446_v25 = vld [vmem:[#allocation2 + $0x420] ss:$12 sps:$4 sm:$0xff]  }
  0x6b   :  { %1242 = vmatpush1.bf16.msra.mxu1 %v2379_v29  ;;  %v2454_v29 = vld [vmem:[#allocation2 + $0x450] ss:$12 sps:$4 sm:$0x7f]  }
  0x6c   :  { %1243 = vmatprep.subr.bf16.mxu1 %v2596_v14 }
  0x6d   :  { %1082 = vmatpush1.bf16.msra.mxu0 %v2368_v27  ;;  %v2449_v27 = vld [vmem:[#allocation2 + $0x438] ss:$12 sps:$4 sm:$0xff]  }
  0x6e   :  { %1083 = vmatprep.subr.bf16.mxu0 %v2374_v28  ;;  %v2452_v28 = vld [vmem:[#allocation2 + $0x454] ss:$12 sps:$4 sm:$0x7f]  }
  0x6f   :  { %1244 = vmatpush1.bf16.msra.mxu1 %v2383_v32  ;;  %v2458_v32 = vld [vmem:[%s2975_s3 + $0x10] ss:$8 sps:$4 sm:$0xff]  }
  0x70   :  { %1245 = vmatprep.subr.bf16.mxu1 %v2596_v14 }
  0x71   :  { %1084 = vmatpush1.bf16.msra.mxu0 %v2372_v30  ;;  %v1020_v30 = vsel %vm1018_vm1, %v2454_v29, 0 }
  0x72   :  { %1085 = vmatprep.subr.bf16.mxu0 %v2378_v31  ;;  %v2460_v31 = vld [vmem:[%s2975_s3 + $0x14] ss:$8 sps:$4 sm:$0xff]  }
  0x73   :  { %1246 = vmatpush1.bf16.msra.mxu1 %v2387_v37  ;;  %v2469_v37 = vld [vmem:[%s2975_s3 + $0x44] ss:$8 sps:$4 sm:$0xff]  }
  0x74   :  { %1247 = vmatprep.subr.bf16.mxu1 %v2596_v14 }
  0x75   :  { %1086 = vmatpush1.bf16.msra.mxu0 %v2376_v35  ;;  %v2466_v35 = vld [vmem:[%s2975_s3 + $0x34] ss:$8 sps:$4 sm:$0xff]  }
  0x76   :  { %1087 = vmatprep.subr.bf16.mxu0 %v2382_v36  ;;  %v2464_v36 = vld [vmem:[%s2975_s3 + $0x30] ss:$8 sps:$4 sm:$0xff]  }
  0x77   :  { %1248 = vmatpush1.bf16.msra.mxu1 %v2391_v40  ;;  %v2470_v40 = vld [vmem:[%s2975_s3 + $0x50] ss:$8 sps:$4 sm:$0xff]  }
  0x78   :  { %1249 = vmatprep.subr.bf16.mxu1 %v2596_v14 }
  0x79   :  { %1088 = vmatpush1.bf16.msra.mxu0 %v2380_v38  ;;  %v2467_v38 = vld [vmem:[%s2975_s3 + $0x40] ss:$8 sps:$4 sm:$0xff]  }
  0x7a   :  { %1089 = vmatprep.subr.bf16.mxu0 %v2386_v39  ;;  %v2472_v39 = vld [vmem:[%s2975_s3 + $0x54] ss:$8 sps:$4 sm:$0xff]  }
  0x7b   :  { %1250 = vmatpush1.bf16.msra.mxu1 %v2395_v43  ;;  %v2478_v43 = vld [vmem:[%s2975_s3 + $0x74] ss:$8 sps:$4 sm:$0xff]  }
  0x7c   :  { %1251 = vmatprep.subr.bf16.mxu1 %v2596_v14 }
  0x7d   :  { %1090 = vmatpush1.bf16.msra.mxu0 %v2384_v41  ;;  %v2475_v41 = vld [vmem:[%s2975_s3 + $0x64] ss:$8 sps:$4 sm:$0xff]  }
  0x7e   :  { %1091 = vmatprep.subr.bf16.mxu0 %v2390_v42  ;;  %v2473_v42 = vld [vmem:[%s2975_s3 + $0x60] ss:$8 sps:$4 sm:$0xff]  }
  0x7f   :  { %1252 = vmatpush1.bf16.msra.mxu1 %v2399_v46  ;;  %v2479_v46 = vld [vmem:[%s2975_s3 + $0x80] ss:$8 sps:$4 sm:$0xff]  }
  0x80   :  { %1253 = vmatprep.subr.bf16.mxu1 %v2596_v14 }
  0x81   :  { %1092 = vmatpush1.bf16.msra.mxu0 %v2388_v44  ;;  %v2476_v44 = vld [vmem:[%s2975_s3 + $0x70] ss:$8 sps:$4 sm:$0xff]  }
  0x82   :  { %1093 = vmatprep.subr.bf16.mxu0 %v2394_v45  ;;  %v2481_v45 = vld [vmem:[%s2975_s3 + $0x84] ss:$8 sps:$4 sm:$0xff]  }
  0x83   :  { %1254 = vmatpush1.bf16.msra.mxu1 %v2403_v49 }
  0x84   :  { %1255 = vmatprep.subr.bf16.mxu1 %v2596_v14 }
  0x85   :  { %1094 = vmatpush1.bf16.msra.mxu0 %v2392_v47  ;;  %v2484_v47 = vld [vmem:[%s2975_s3 + $0x94] ss:$8 sps:$4 sm:$0xff]  }
  0x86   :  { %1095 = vmatprep.subr.bf16.mxu0 %v2398_v48  ;;  %v2482_v48 = vld [vmem:[%s2975_s3 + $0x90] ss:$8 sps:$4 sm:$0xff]  }
  0x87   :  { %1256 = vmatpush1.bf16.msra.mxu1 %v2407_v52 }
  0x88   :  { %1257 = vmatprep.subr.bf16.mxu1 %v2596_v14 }
  0x89   :  { %1096 = vmatpush1.bf16.msra.mxu0 %v2396_v50  ;;  %v2487_v50 = vld [vmem:[%s2975_s3 + $0xa4] ss:$8 sps:$4 sm:$0xff]  }
  0x8a   :  { %1097 = vmatprep.subr.bf16.mxu0 %v2402_v51 }
  0x8b   :  { %1258 = vmatpush1.bf16.msra.mxu1 %v2411_v55  ;;  %v2485_v55 = vld [vmem:[%s2975_s3 + $0xa0] ss:$8 sps:$4 sm:$0xff]  }
  0x8c   :  { %1259 = vmatprep.subr.bf16.mxu1 %v2596_v14 }
  0x8d   :  { %1098 = vmatpush1.bf16.msra.mxu0 %v2400_v53 }
  0x8e   :  { %1099 = vmatprep.subr.bf16.mxu0 %v2406_v54 }
  0x8f   :  { %1260 = vmatpush1.bf16.msra.mxu1 %v1026_v62  ;;  %v250_v62 = vlaneseq }
  0x90   :  { %1585 = vmatprep.subr.bf16.mxu1 %v2457_v16  ;;  %v2526_v16 = vld [vmem:[%s2977_s5] sm:$0xff]  }
  0x91   :  { %1100 = vmatpush1.bf16.msra.mxu0 %v2404_v57  ;;  %v2488_v57 = vld [vmem:[%s2975_s3 + $0xb0] ss:$8 sps:$4 sm:$0xff]  }
  0x92   :  { %1110 = vmatprep.subr.bf16.mxu0 %v2410_v58  ;;  %1264 = vmatmul.mubr.bf16.vlgmr.msra.gmra.mrb[8].mxu1 %v2708_v63  ;;  %v2493_v58 = vld [vmem:[%s2975_s3 + $0xc4] ss:$8 sps:$4 sm:$0xff]  }
  0x93   :  { %1586 = vmatpush1.bf16.msra.mxu1 %v2455_v15 }
  0x94   :  { %1102 = vmatmul.mubr.bf16.vlgmr.msra.gmra.mrb[0].mxu0 %v2679_v12  ;;  %v2431_v12 = vld [vmem:[#allocation2 + $0x3a8] ss:$12 sps:$4 sm:$0xff]   ;;  %1587 = vmatprep.subr.bf16.mxu1 %v2460_v31 }
  0x95   :  { %1111 = vmatpush1.bf16.msra.mxu0 %v2408_v60  ;;  %2096 = vmatprep.mubr.msk.bf16.mxu0 %vm1014_vm0, %v2692_v34  ;;  %v2461_v34 = vld [vmem:[%s2975_s3 + $0x20] ss:$8 sps:$4 sm:$0xff]   ;;  %v2496_v60 = vld [vmem:[%s2975_s3 + $0xd4] ss:$8 sps:$4 sm:$0xff]  }
  0x96   :  { %1112 = vmatprep.subr.bf16.mxu0 %v2414_v61  ;;  %v2494_v61 = vld [vmem:[%s2975_s3 + $0xd0] ss:$8 sps:$4 sm:$0xff]  }
  0x97   :  { %1588 = vmatpush1.bf16.msra.mxu1 %v2458_v32 }
  0x98   :  { %1589 = vmatprep.subr.bf16.mxu1 %v2463_v33 }
  0x99   :  { %1113 = vmatpush1.bf16.msra.mxu0 %v2412_v0  ;;  %v2499_v0 = vld [vmem:[%s2975_s3 + $0xe4] ss:$8 sps:$4 sm:$0xff]  }
  0x9a   :  { %1114 = vmatprep.subr.bf16.mxu0 %v2418_v1  ;;  %v2497_v1 = vld [vmem:[%s2975_s3 + $0xe0] ss:$8 sps:$4 sm:$0xff]  }
  0x9b   :  { %1590 = vmatpush1.bf16.msra.mxu1 %v2461_v34 }
  0x9c   :  { %1591 = vmatprep.subr.bf16.mxu1 %v2466_v35 }
  0x9d   :  { %1115 = vmatpush1.bf16.msra.mxu0 %v2416_v2 }
  0x9e   :  { %1116 = vmatprep.subr.bf16.mxu0 %v2421_v3  ;;  %v2502_v3 = vld [vmem:[%s2975_s3 + $0xf4] ss:$8 sps:$4 sm:$0xff]  }
  0x9f   :  { %1592 = vmatpush1.bf16.msra.mxu1 %v2464_v36 }
  0xa0   :  { %1593 = vmatprep.subr.bf16.mxu1 %v2469_v37 }
  0xa1   :  { %1117 = vmatpush1.bf16.msra.mxu0 %v2419_v4  ;;  %v248_v4 = vld [vmem:[%s2974_s2] sm:$0x7] }
  0xa2   :  { %1118 = vmatprep.subr.bf16.mxu0 %v2424_v5  ;;  %v2500_v5 = vld [vmem:[%s2975_s3 + $0xf0] ss:$8 sps:$4 sm:$0xff]  }
  0xa3   :  { %1594 = vmatpush1.bf16.msra.mxu1 %v2467_v38 }
  0xa4   :  { %1595 = vmatprep.subr.bf16.mxu1 %v2472_v39 }
  0xa5   :  { %1119 = vmatpush1.bf16.msra.mxu0 %v2422_v6 }
  0xa6   :  { %1120 = vmatprep.subr.bf16.mxu0 %v2427_v7  ;;  %v2505_v7 = vld [vmem:[%s2975_s3 + $0x104] ss:$8 sps:$4 sm:$0xff]  }
  0xa7   :  { %1596 = vmatpush1.bf16.msra.mxu1 %v2470_v40 }
  0xa8   :  { %1597 = vmatprep.subr.bf16.mxu1 %v2475_v41 }
  0xa9   :  { %1121 = vmatpush1.bf16.msra.mxu0 %v2425_v8 }
  0xaa   :  { %1122 = vmatprep.subr.bf16.mxu0 %v2430_v9 }
  0xab   :  { %1598 = vmatpush1.bf16.msra.mxu1 %v2473_v42 }
  0xac   :  { %1599 = vmatprep.subr.bf16.mxu1 %v2478_v43  ;;  %v2503_v43 = vld [vmem:[%s2975_s3 + $0x100] ss:$8 sps:$4 sm:$0xff]  }
  0xad   :  { %1123 = vmatpush1.bf16.msra.mxu0 %v2428_v10 }
  0xae   :  { %1124 = vmatprep.subr.bf16.mxu0 %v2433_v11 }
  0xaf   :  { %1600 = vmatpush1.bf16.msra.mxu1 %v2476_v44 }
  0xb0   :  { %1601 = vmatprep.subr.bf16.mxu1 %v2481_v45  ;;  %v2508_v45 = vld [vmem:[%s2975_s3 + $0x114] ss:$8 sps:$4 sm:$0xff]  }
  0xb1   :  { %1125 = vmatpush1.bf16.msra.mxu0 %v2431_v12 }
  0xb2   :  { %1126 = vmatprep.subr.bf16.mxu0 %v2436_v13 }
  0xb3   :  { %1602 = vmatpush1.bf16.msra.mxu1 %v2479_v46  ;;  %v2506_v46 = vld [vmem:[%s2975_s3 + $0x110] ss:$8 sps:$4 sm:$0xff]  }
  0xb4   :  { %1603 = vmatprep.subr.bf16.mxu1 %v2484_v47  ;;  %v2511_v47 = vld [vmem:[%s2975_s3 + $0x124] ss:$8 sps:$4 sm:$0xff]  }
  0xb5   :  { %1127 = vmatpush1.bf16.msra.mxu0 %v2434_v17  ;;  %v2527_v17 = vld [vmem:[%s2977_s5 + $0x8] sm:$0xff]  }
  0xb6   :  { %1128 = vmatprep.subr.bf16.mxu0 %v2439_v18  ;;  %v2528_v18 = vld [vmem:[%s2977_s5 + $0x10] sm:$0xff]  }
  0xb7   :  { %1604 = vmatpush1.bf16.msra.mxu1 %v2482_v48  ;;  %v2509_v48 = vld [vmem:[%s2975_s3 + $0x120] ss:$8 sps:$4 sm:$0xff]  }
  0xb8   :  { %1605 = vmatprep.subr.bf16.mxu1 %v2487_v50  ;;  %v2512_v50 = vld [vmem:[%s2975_s3 + $0x130] ss:$8 sps:$4 sm:$0xff]  }
  0xb9   :  { %1129 = vmatpush1.bf16.msra.mxu0 %v2437_v19  ;;  %v2529_v19 = vld [vmem:[%s2977_s5 + $0x18] sm:$0xff]  }
  0xba   :  { %1130 = vmatprep.subr.bf16.mxu0 %v2442_v20  ;;  %v2530_v20 = vld [vmem:[%s2977_s5 + $0x20] sm:$0xff]  }
  0xbb   :  { %1606 = vmatpush1.bf16.msra.mxu1 %v2485_v55  ;;  %v2597_v55 = vmov 65535  }
  0xbc   :  { %1607 = vmatprep.subr.bf16.mxu1 %v2490_v56  ;;  %v1577_v56 = vsel %vm1575_vm2, 4294967295, %v2597_v55 }
  0xbd   :  { %1131 = vmatpush1.bf16.msra.mxu0 %v2440_v21  ;;  %v2531_v21 = vld [vmem:[%s2977_s5 + $0x28] sm:$0xff]  }
  0xbe   :  { %1132 = vmatprep.subr.bf16.mxu0 %v2445_v22  ;;  %v2532_v22 = vld [vmem:[%s2977_s5 + $0x30] sm:$0xff]  }
  0xbf   :  { %1608 = vmatpush1.bf16.msra.mxu1 %v2488_v57  ;;  %v2518_v57 = vld [vmem:[%s2975_s3 + $0x150] ss:$8 sps:$4 sm:$0xff]  }
  0xc0   :  { %1609 = vmatprep.subr.bf16.mxu1 %v2493_v58  ;;  %v2523_v58 = vld [vmem:[%s2975_s3 + $0x164] ss:$8 sps:$4 sm:$0xff]  }
  0xc1   :  { %1133 = vmatpush1.bf16.msra.mxu0 %v2443_v23  ;;  %v2533_v23 = vld [vmem:[%s2977_s5 + $0x38] sm:$0xff]  }
  0xc2   :  { %1134 = vmatprep.subr.bf16.mxu0 %v2448_v24 }
  0xc3   :  { %1610 = vmatpush1.bf16.msra.mxu1 %v2491_v59 }
  0xc4   :  { %1611 = vmatprep.subr.bf16.mxu1 %v2496_v60  ;;  %v1578_v60 = vsel %vm1576_vm3, %v1577_v56, 0 }
  0xc5   :  { %1135 = vmatpush1.bf16.msra.mxu0 %v2446_v25 }
  0xc6   :  { %1136 = vmatprep.subr.bf16.mxu0 %v2451_v26 }
  0xc7   :  { %1612 = vmatpush1.bf16.msra.mxu1 %v2494_v61  ;;  %v2521_v61 = vld [vmem:[%s2975_s3 + $0x160] ss:$8 sps:$4 sm:$0xff]  }
  0xc8   :  { %1613 = vmatprep.subr.bf16.mxu1 %v2499_v0 }
  0xc9   :  { %1137 = vmatpush1.bf16.msra.mxu0 %v2449_v27  ;;  %v2534_v27 = vld [vmem:[%s2977_s5 + $0x40] sm:$0xff]  }
  0xca   :  { %2095 = vmatprep.subr.msk.bf16.mxu0 %vm1018_vm1, %v2452_v28 }
  0xcb   :  { %1614 = vmatpush1.bf16.msra.mxu1 %v2497_v1 }
  0xcc   :  { %1615 = vmatprep.subr.bf16.mxu1 %v2502_v3 }
  0xcd   :  { %1139 = vmatpush1.bf16.msra.mxu0 %v1020_v30 }
  0xce   :  { %1775 = vmatprep.subr.bf16.mxu0 %v2596_v14 }
  0xcf   :  { %1616 = vmatpush1.bf16.msra.mxu1 %v2500_v5  ;;  %v2536_v5 = vld [vmem:[%s2977_s5 + $0x50] sm:$0xff]  }
  0xd0   :  { %1143 = vmatmul.mubr.bf16.vlgmr.msra.gmra.mrb[0].mxu0 %v2708_v63  ;;  %v2802_v63 = vshrl.u32 %v250_v62, 7  ;;  %1626 = vmatprep.subr.bf16.mxu1 %v2505_v7 }
  0xd1   :  { %1776 = vmatpush1.bf16.msra.mxu0 %v2526_v16  ;;  %v1324_v16 = vld [vmem:[%s2976_s4] sm:$0x3] }
  0xd2   :  { %v260_v2 = vsub.s32 2, %v2802_v63  ;;  %1777 = vmatprep.subr.bf16.mxu0 %v2596_v14  ;;  %v252_v30 = vsub.s32 0, %v2802_v63  ;;  %v256_v31 = vsub.s32 1, %v2802_v63  ;;  %v2544_v63 = vld [vmem:[%s2979_s7 + $0x38] sm:$0x7f]  }
  0xd4   :  { %v261_v6 = vrot.slane %v248_v4, %v260_v2  ;;  %v253_v32 = vrot.slane %v248_v4, %v252_v30  ;;  %v257_v33 = vrot.slane %v248_v4, %v256_v31  ;;  %v2535_v4 = vld [vmem:[%s2977_s5 + $0x48] sm:$0xff]  }
  0xd5   :  { %1778 = vmatpush1.bf16.msra.mxu0 %v2527_v17  ;;  %v1329_v17 = vrot.slane %v1324_v16, %v252_v30  ;;  %v1892_v30 = vsel %vm1891_vm7, 4294967295, %v2597_v55 }
  0xd6   :  { %1779 = vmatprep.subr.bf16.mxu0 %v2596_v14 }
  0xd9   :  { %1780 = vmatpush1.bf16.msra.mxu0 %v2528_v18  ;;  %v1333_v18 = vrot.slane %v1324_v16, %v256_v31  ;;  %v1893_v31 = vsel %vm1018_vm1, %v1892_v30, 0 }
  0xda   :  { %1781 = vmatprep.subr.bf16.mxu0 %v2596_v14 }
  0xdd   :  { %1782 = vmatpush1.bf16.msra.mxu0 %v2529_v19 }
  0xde   :  { %1783 = vmatprep.subr.bf16.mxu0 %v2596_v14 }
  0xe1   :  { %1784 = vmatpush1.bf16.msra.mxu0 %v2530_v20 }
  0xe2   :  { %1785 = vmatprep.subr.bf16.mxu0 %v2596_v14 }
  0xe5   :  { %1786 = vmatpush1.bf16.msra.mxu0 %v2531_v21 }
  0xe6   :  { %1787 = vmatprep.subr.bf16.mxu0 %v2596_v14 }
  0xe9   :  { %1788 = vmatpush1.bf16.msra.mxu0 %v2532_v22 }
  0xea   :  { %1789 = vmatprep.subr.bf16.mxu0 %v2596_v14 }
  0xed   :  { %1790 = vmatpush1.bf16.msra.mxu0 %v2533_v23 }
  0xee   :  { %1791 = vmatprep.subr.bf16.mxu0 %v2596_v14 }
  0xf1   :  { %1792 = vmatpush1.bf16.msra.mxu0 %v2534_v27 }
  0xf2   :  { %1793 = vmatprep.subr.bf16.mxu0 %v2596_v14 }
  0xf5   :  { %1794 = vmatpush1.bf16.msra.mxu0 %v2535_v4 }
  0xf6   :  { %1795 = vmatprep.subr.bf16.mxu0 %v2596_v14 }
 0x109   :  { %v2186_v49 = vpop.f32.mrb[0].mxu1 }
 0x10a   :  { %v2187_v51 = vpop.f32.mrb[1].mxu1 }
 0x10b   :  { %v2188_v52 = vadd.f32 %v2187_v51, %v2186_v49  ;;  %v2189_v53 = vpop.f32.mrb[2].mxu1  ;;  %v2514_v49 = vld [vmem:[%s2975_s3 + $0x134] ss:$8 sps:$4 sm:$0xff]   ;;  %v2517_v51 = vld [vmem:[%s2975_s3 + $0x144] ss:$8 sps:$4 sm:$0xff]  }
 0x10c   :  { %v2190_v54 = vpop.f32.mrb[3].mxu1  ;;  %v2520_v53 = vld [vmem:[%s2975_s3 + $0x154] ss:$8 sps:$4 sm:$0xff]  }
 0x10d   :  { %v1186_v8 = vadd.f32 %v2188_v52, %v261_v6  ;;  %v2515_v52 = vld [vmem:[%s2975_s3 + $0x140] ss:$8 sps:$4 sm:$0xff]   ;;  %v1323_v54 = vld [vmem:[%s2975_s3 + $0x170] sm:$0xff]  ;;  %v1770_v6 = vsel %vm1018_vm1, 4294967295, %v2597_v55 }
 0x10e   :  { %v2145_v59 = vcombine.high %v1323_v54, %v1323_v54  ;;  %v2144_v62 = vcombine.low %v1323_v54, %v1323_v54  ;;  %v1771_v7 = vsel %vm1769_vm5, %v1770_v6, 0 }
 0x110   :  { %v1583_v0 = vand.u32 %v2145_v59, %v1578_v60  ;;  %v1580_v1 = vand.u32 %v2144_v62, %v1578_v60 }
 0x129   :  { %v2208_v9 = vpop.f32.mrb[4].mxu1 }
 0x12a   :  { %v2209_v10 = vpop.f32.mrb[5].mxu1 }
 0x12b   :  { %v2210_v11 = vadd.f32 %v2209_v10, %v2208_v9  ;;  %v2211_v12 = vpop.f32.mrb[6].mxu1  ;;  %v2537_v9 = vld [vmem:[%s2979_s7] sm:$0xff]   ;;  %v2598_v10 = vmov 0.0  }
 0x12c   :  { %v2212_v13 = vpop.f32.mrb[7].mxu1  ;;  %v2540_v12 = vld [vmem:[%s2979_s7 + $0x18] sm:$0xff]  }
 0x12d   :  { %v1226_v15 = vadd.f32 %v2210_v11, %v1186_v8  ;;  %v1773_v8 = vand.u32 %v2536_v5, %v1771_v7  ;;  %v2538_v11 = vld [vmem:[%s2979_s7 + $0x8] sm:$0xff]   ;;  %v2541_v13 = vld [vmem:[%s2979_s7 + $0x20] sm:$0xff]  }
 0x12f   :  { %1796 = vmatpush1.bf16.msra.mxu0 %v1773_v8 }
 0x165   :  { %v1265_v24 = vpop.f32.mrb[8].mxu1 }
 0x166   :  { %v2854_v25 = vadd.f32 %v1265_v24, %v1226_v15  ;;  %v1267_v26 = vpop.f32.mrb[9].mxu1  ;;  %v2542_v15 = vld [vmem:[%s2979_s7 + $0x28] sm:$0xff]  }
 0x167   :  { %v1268_v28 = vpop.f32.mrb[10].mxu1 }
 0x168   :  { %v1269_v29 = vpop.f32.mrb[11].mxu1  ;;  %v1273_v2 = vmax.f32 %v2854_v25, 0.0 }
 0x169   :  { %v2543_v29 = vld [vmem:[%s2979_s7 + $0x30] sm:$0xff]  }
 0x16a   :  { %v1276_v3 = vpack.c.bf16 %v1273_v2, %v1273_v2 }
 0x1a3   :  { %v1144_v34 = vpop.f32.mrb[0].mxu0 }
 0x1a4   :  { %v2243_v35 = vadd.f32 %v1144_v34, %v253_v32  ;;  %v1146_v36 = vpop.f32.mrb[1].mxu0  ;;  %v1895_v32 = vand.u32 %v2544_v63, %v1893_v31 }
 0x1a5   :  { %v2244_v37 = vadd.f32 %v1146_v36, %v257_v33  ;;  %v1148_v38 = vpop.f32.mrb[2].mxu0  ;;  %v2147_v33 = vld [vmem:[%s2978_s6] ss:$0 sm:$0xff]  ;;  %s2567_s6 = scalar_lea.vmem %s1946_s30, 128 }
 0x1a6   :  { %v1271_v39 = vmax.f32 %v2243_v35, 0.0  ;;  %v1149_v40 = vpop.f32.mrb[3].mxu0  ;;  %p2568_p8 = scmp.ne.s32.totalorder %s1946_s30, %s2567_s6  ;;  %p2573_p10 = scmp.lt.s32.totalorder %s2567_s6, %s2567_s6 }
 0x1a7   :  { %v1272_v41 = vmax.f32 %v2244_v37, 0.0 }
 0x1a8   :  { %v1274_v44 = vpack.c.bf16 %v1271_v39, %v1271_v39  ;;  %p2574_p11 = por %p2573_p10, %p2572_p9 }
 0x1a9   :  { %v1275_v42 = vpack.c.bf16 %v1272_v41, %v1272_v41  ;;  %v2160_v41 = vld [vmem:[%s2980_s8] ss:$0 sm:$0xff] }
 0x1aa   :  { %p2575_p12 = pnand %p2574_p11, %p2568_p8 }
 0x1ab   :  { %1617 = vmatprep.mubr.bf16.mxu1 %v1275_v42 }
 0x1ac   :  { %1618 = vmatmul.mubr.bf16.vlgmr.msra.gmra.mrb[12].mxu1 %v1274_v44 }
 0x1ad   :  { %1627 = vmatpush1.bf16.msra.mxu1 %v2503_v43  ;;  %1658 = vmatprep.mubr.bf16.mxu1 %v2596_v14  ;;  %v2539_v14 = vld [vmem:[%s2979_s7 + $0x10] sm:$0xff]  }
 0x1ae   :  { %1628 = vmatprep.subr.bf16.mxu1 %v2508_v45 }
 0x1b1   :  { %1629 = vmatpush1.bf16.msra.mxu1 %v2506_v46 }
 0x1b2   :  { %1630 = vmatprep.subr.bf16.mxu1 %v2511_v47 }
 0x1b5   :  { %1631 = vmatpush1.bf16.msra.mxu1 %v2509_v48 }
 0x1b6   :  { %1632 = vmatprep.subr.bf16.mxu1 %v2514_v49 }
 0x1b9   :  { %1633 = vmatpush1.bf16.msra.mxu1 %v2512_v50 }
 0x1ba   :  { %1634 = vmatprep.subr.bf16.mxu1 %v2517_v51 }
 0x1bd   :  { %1635 = vmatpush1.bf16.msra.mxu1 %v2515_v52 }
 0x1be   :  { %1636 = vmatprep.subr.bf16.mxu1 %v2520_v53 }
 0x1c1   :  { %1637 = vmatpush1.bf16.msra.mxu1 %v2518_v57 }
 0x1c2   :  { %1638 = vmatprep.subr.bf16.mxu1 %v2523_v58 }
 0x1c5   :  { %1639 = vmatpush1.bf16.msra.mxu1 %v2521_v61 }
 0x1c6   :  { %1640 = vmatprep.subr.bf16.mxu1 %v1583_v0 }
 0x1c9   :  { %1641 = vmatpush1.bf16.msra.mxu1 %v1580_v1 }
 0x1ca   :  { %2223 = vmatprep.subr.bf16.mxu1 %v2598_v10 }
 0x1cc   :  { %2146 = vmatmul.mubr.msk.bf16.vlgmr.msra.gmra.mrb[12].mxu1 %vm1571_vm4, %v1276_v3 }
 0x1cd   :  { %2224 = vmatpush3.bf16.msra.mxu1 %v2537_v9  ;;  %2239 = vmatprep.mubr.msk.bf16.mxu1 %vm2599_vm8, %v2598_v10 }
 0x1ce   :  { %2225 = vmatprep.subr.bf16.mxu1 %v2598_v10 }
 0x1d1   :  { %2226 = vmatpush3.bf16.msra.mxu1 %v2538_v11 }
 0x1d2   :  { %2227 = vmatprep.subr.bf16.mxu1 %v2598_v10 }
 0x1d5   :  { %2228 = vmatpush3.bf16.msra.mxu1 %v2539_v14 }
 0x1d6   :  { %2229 = vmatprep.subr.bf16.mxu1 %v2598_v10 }
 0x1d9   :  { %2230 = vmatpush3.bf16.msra.mxu1 %v2540_v12 }
 0x1da   :  { %2231 = vmatprep.subr.bf16.mxu1 %v2598_v10 }
 0x1dd   :  { %2232 = vmatpush3.bf16.msra.mxu1 %v2541_v13 }
 0x1de   :  { %2233 = vmatprep.subr.bf16.mxu1 %v2598_v10 }
 0x1e1   :  { %2234 = vmatpush3.bf16.msra.mxu1 %v2542_v15 }
 0x1e2   :  { %2235 = vmatprep.subr.bf16.mxu1 %v2598_v10 }
 0x1e5   :  { %2236 = vmatpush3.bf16.msra.mxu1 %v2543_v29 }
 0x1e6   :  { %2237 = vmatprep.subr.bf16.mxu1 %v2598_v10 }
 0x1e9   :  { %2238 = vmatpush3.bf16.msra.mxu1 %v1895_v32 }
 0x29f   :  { %v1660_v19 = vpop.f32.mrb[12].mxu1 }
 0x2a0   :  { %v2245_v20 = vadd.f32 %v1660_v19, %v1329_v17  ;;  %v1662_v21 = vpop.f32.mrb[13].mxu1 }
 0x2a1   :  { %v2246_v22 = vadd.f32 %v1662_v21, %v1333_v18  ;;  %v1664_v23 = vpop.f32.mrb[14].mxu1 }
 0x2a2   :  { %v1667_v24 = vmax.f32 %v2245_v20, 0.0  ;;  %v1665_v25 = vpop.f32.mrb[15].mxu1 }
 0x2a3   :  { %v1668_v26 = vmax.f32 %v2246_v22, 0.0 }
 0x2a4   :  { %v1669_v28 = vpack.c.bf16 %v1667_v24, %v1667_v24 }
 0x2a5   :  { %v1670_v27 = vpack.c.bf16 %v1668_v26, %v1668_v26 }
 0x2a7   :  { %2159 = vmatprep.mubr.msk.bf16.mxu0 %vm1765_vm6, %v1670_v27 }
 0x2a8   :  { %1808 = vmatmul.mubr.bf16.vlgmr.msra.gmra.mrb[4].mxu0 %v1669_v28 }
 0x37b   :  { %v1809_v34 = vpop.f32.mrb[4].mxu0 }
 0x37c   :  { %v1810_v35 = vadd.f32 %v2147_v33, %v1809_v34  ;;  %v1811_v36 = vpop.f32.mrb[5].mxu0 }
 0x37d   :  { %v1812_v37 = vpop.f32.mrb[6].mxu0 }
 0x37e   :  { %v1815_v38 = vmax.f32 %v1810_v35, 0.0  ;;  %v1813_v39 = vpop.f32.mrb[7].mxu0 }
 0x380   :  { %v1816_v40 = vpack.c.bf16 %v1815_v38, %v1815_v38 }
 0x382   :  { %2240 = vmatmul.mubr.msk.bf16.vlgmr.msra.gmra.mrb[16].mxu1 %vm1887_vm9, %v1816_v40 }
 0x455   :  { %v1931_v42 = vpop.f32.mrb[16].mxu1 }
 0x456   :  { %v1932_v43 = vadd.f32 %v2160_v41, %v1931_v42  ;;  %v2241_v44 = vpop.f32.mrb[17].mxu1 }
 0x457   :  { %v1934_v45 = vpop.f32.mrb[18].mxu1 }
 0x458   :  { %v2242_v46 = vpop.f32.mrb[19].mxu1  ;;  %1938 = vst.msk [vmem:[#allocation5] sm:$0xff] %vm1937_vm10, %v1932_v43 }
 0x459   :  { %2578 = shalt.err (!%p2575_p12)
}
 0x45a   :  { %s2579_s8 = scalar_lea.hbm %s2981_s9, 128 }
 0x45b   :  { %p2580_p13 = scmp.ne.s32.totalorder %s2981_s9, %s2579_s8  ;;  %p2583_p0 = scmp.lt.u32.totalorder %s2579_s8, %s2981_s9 }
 0x45d   :  { %p2585_p1 = pnand %p2583_p0, %p2580_p13 }
 0x45f   :  { %2588 = shalt.err (!%p2585_p1)
}
 0x460   :  { %1948 = dma.vmem_to_hbm [thread:$0]  %s1946_s30, 128, %s2981_s9, [#allocation4]  }
 0x461   :  { %2591 = dma.done.wait [#allocation4], 128  }
 0x462   :  { %2592 = vsyncadd [#allocation4], 4294967168 }
 0x463   :  { %1952 = vsyncpa [#allocation3], 1 }
 0x464   :  { %1953 = vsyncpa [#allocation4], 1 }

</bundles_post_ra>
